<compile_context>
chip_gen: v7x
topology: tpu7x:2x2x1
jax: 0.10.0
libtpu: 0.0.40
codegen_flags: <defaults>
</compile_context>

<pallas_src>
import functools

import jax
import jax.numpy as jnp
from jax import lax
from jax.experimental import pallas as pl
from jax.experimental.pallas import tpu as pltpu


# ---------------------------------------------------------------------------
# Kernel
# ---------------------------------------------------------------------------
def _convbn_kernel(p_ref, w_ref, scale_ref, bias_ref, o_ref, acc_ref):
    """One (tm, tn) output tile; K is the innermost ("arbitrary") grid axis."""
    k = pl.program_id(2)

    @pl.when(k == 0)
    def _():
        acc_ref[...] = jnp.zeros_like(acc_ref)

    acc_ref[...] += jnp.dot(p_ref[...], w_ref[...],
                            preferred_element_type=jnp.float32)

    @pl.when(k == pl.num_programs(2) - 1)
    def _():
        # Folded-BN epilogue: per-output-channel affine, lane-dense store.
        o_ref[...] = (acc_ref[...] * scale_ref[...]
                      + bias_ref[...]).astype(o_ref.dtype)


# ---------------------------------------------------------------------------
# Helpers
# ---------------------------------------------------------------------------
def _round_up(x, m):
    return ((x + m - 1) // m) * m


def _pick_tile(dim, preferred, align):
    """Return (tile, padded_dim): tile <= preferred, multiple of `align`,
    and padded_dim a multiple of tile."""
    if dim <= preferred:
        t = _round_up(dim, align)
        return t, t
    t = preferred  # preferred is a multiple of align
    return t, _round_up(dim, t)


def _im2col(x, ksize, stride, padding, dilation):
    """x: [N, Cin, H, W] -> patches [N*OH*OW, Cin*KH*KW] (+ (OH, OW)).

    Last-axis ordering is (Cin, KH, KW), matching PyTorch's OIHW weight
    flattening.  The NCHW->NHWC transpose is done once (not per tap).
    """
    n, c, h, w = x.shape
    kh = kw = ksize
    oh = (h + 2 * padding - dilation * (kh - 1) - 1) // stride + 1
    ow = (w + 2 * padding - dilation * (kw - 1) - 1) // stride + 1

    x_nhwc = jnp.transpose(x, (0, 2, 3, 1))
    xp = jnp.pad(x_nhwc, ((0, 0), (padding, padding), (padding, padding), (0, 0)))

    cols = []
    for ih in range(kh):
        for iw in range(kw):
            h0 = ih * dilation
            w0 = iw * dilation
            sl = xp[:, h0:h0 + stride * oh:stride,
                    w0:w0 + stride * ow:stride, :]          # [N, OH, OW, Cin]
            cols.append(sl)
    patches = jnp.stack(cols, axis=-1)                       # [N,OH,OW,Cin,KH*KW]
    patches = patches.reshape(n * oh * ow, c * kh * kw)      # [M, K]
    return patches, oh, ow


# ---------------------------------------------------------------------------
# Forward wrapper
# ---------------------------------------------------------------------------
@functools.partial(jax.jit,
                   static_argnames=("ksize", "stride", "padding", "dilation"))
def conv_bn_forward(x, weight, gamma, beta, running_mean, running_var,
                    *, ksize, stride, padding, dilation, eps=1e-5):
    """x: [N, Cin, H, W]  weight: [Cout, Cin, KH, KW]  -> [N, Cout, OH, OW]"""
    n, cin, _, _ = x.shape
    cout = weight.shape[0]
    out_dtype = x.dtype

    patches, oh, ow = _im2col(x, ksize, stride, padding, dilation)      # [M, K]
    w2d = weight.reshape(cout, cin * ksize * ksize).T                   # [K, Cout]

    # Fold inference-mode BatchNorm into a per-output-channel affine (f32).
    inv_std = lax.rsqrt(running_var.astype(jnp.float32) + eps)
    g32 = gamma.astype(jnp.float32)
    scale = (g32 * inv_std).reshape(1, cout)
    bias = (beta.astype(jnp.float32)
            - running_mean.astype(jnp.float32) * g32 * inv_std).reshape(1, cout)

    m, k = patches.shape

    # Generation-friendly tiles: tm=512, tn<=256 (lane-dense, matches 256x256
    # MXU), tk<=512.  Everything padded so blocks tile the arrays exactly and
    # satisfy the (8, 128) constraint.
    tm, m_pad = _pick_tile(m, 512, 8)
    tk, k_pad = _pick_tile(k, 512, 128)
    tn, cout_pad = _pick_tile(cout, 256, 128)

    # Zero-pad (numerically exact) and cast MXU operands to bf16.
    patches_p = jnp.pad(patches, ((0, m_pad - m), (0, k_pad - k))).astype(jnp.bfloat16)
    w2d_p = jnp.pad(w2d, ((0, k_pad - k), (0, cout_pad - cout))).astype(jnp.bfloat16)
    scale_p = jnp.pad(scale, ((0, 0), (0, cout_pad - cout)))
    bias_p = jnp.pad(bias, ((0, 0), (0, cout_pad - cout)))

    grid = (m_pad // tm, cout_pad // tn, k_pad // tk)

    out2d = pl.pallas_call(
        _convbn_kernel,
        out_shape=jax.ShapeDtypeStruct((m_pad, cout_pad), out_dtype),
        grid_spec=pltpu.PrefetchScalarGridSpec(
            num_scalar_prefetch=0,
            grid=grid,
            in_specs=[
                pl.BlockSpec((tm, tk), lambda i, j, kk: (i, kk)),
                pl.BlockSpec((tk, tn), lambda i, j, kk: (kk, j)),
                pl.BlockSpec((1, tn), lambda i, j, kk: (0, j)),
                pl.BlockSpec((1, tn), lambda i, j, kk: (0, j)),
            ],
            out_specs=pl.BlockSpec((tm, tn), lambda i, j, kk: (i, j)),
            scratch_shapes=[pltpu.VMEM((tm, tn), jnp.float32)],
        ),
        compiler_params=pltpu.CompilerParams(
            dimension_semantics=("parallel", "parallel", "arbitrary"),
            vmem_limit_bytes=48 * 1024 * 1024,
        ),
    )(patches_p, w2d_p, scale_p, bias_p)

    # Strip padding, back to NCHW.
    out2d = out2d[:m, :cout]
    y = out2d.reshape(n, oh, ow, cout).transpose(0, 3, 1, 2)
    return y


# ---------------------------------------------------------------------------
# Reference (same bf16 operands, f32 accumulation) + self-test
# ---------------------------------------------------------------------------
def _reference(x, weight, gamma, beta, running_mean, running_var,
               *, ksize, stride, padding, dilation, eps=1e-5):
    conv = lax.conv_general_dilated(
        x.astype(jnp.bfloat16), weight.astype(jnp.bfloat16),
        window_strides=(stride, stride),
        padding=[(padding, padding), (padding, padding)],
        rhs_dilation=(dilation, dilation),
        dimension_numbers=("NCHW", "OIHW", "NCHW"),
        preferred_element_type=jnp.float32,
    )
    inv_std = lax.rsqrt(running_var + eps)
    scale = (gamma * inv_std).reshape(1, -1, 1, 1)
    bias = (beta - running_mean * gamma * inv_std).reshape(1, -1, 1, 1)
    return (conv * scale + bias).astype(x.dtype)


if __name__ == "__main__":
    # Hyperparameters implied by ConvBN.__init__
    in_channels, out_channels = 4, 8
    k_size, stride, padding, dilation = 3, 1, 1, 1
    batch, spatial = 2, 16

    key = jax.random.PRNGKey(0)
    kx, kw, kg, kb, km, kv = jax.random.split(key, 6)

    x = jax.random.normal(kx, (batch, in_channels, spatial, spatial), jnp.float32)
    weight = jax.random.normal(
        kw, (out_channels, in_channels, k_size, k_size), jnp.float32) * 0.1
    gamma = 1.0 + 0.1 * jax.random.normal(kg, (out_channels,), jnp.float32)
    beta = 0.1 * jax.random.normal(kb, (out_channels,), jnp.float32)
    running_mean = 0.1 * jax.random.normal(km, (out_channels,), jnp.float32)
    running_var = jnp.abs(jax.random.normal(kv, (out_channels,), jnp.float32)) + 0.5

    y = conv_bn_forward(x, weight, gamma, beta, running_mean, running_var,
                        ksize=k_size, stride=stride, padding=padding,
                        dilation=dilation)
    y = jax.block_until_ready(y)

    y_ref = _reference(x, weight, gamma, beta, running_mean, running_var,
                       ksize=k_size, stride=stride, padding=padding,
                       dilation=dilation)

    out_h = (spatial + 2 * padding - dilation * (k_size - 1) - 1) // stride + 1
    assert y.shape == (batch, out_channels, out_h, out_h)
    assert jnp.allclose(y, y_ref, atol=2e-3, rtol=2e-3), (
        float(jnp.max(jnp.abs(y - y_ref))))

    print("KERNEL_OK")
</pallas_src>

<mosaic_0001>
module attributes {stable_mosaic.version = 11 : i64} {
  func.func @_convbn_kernel(%arg0: i32, %arg1: i32, %arg2: i32, %arg3: memref<512x128xbf16, #tpu.memory_space<vmem>>, %arg4: memref<128x128xbf16, #tpu.memory_space<vmem>>, %arg5: memref<1x128xf32, #tpu.memory_space<vmem>>, %arg6: memref<1x128xf32, #tpu.memory_space<vmem>>, %arg7: memref<512x128xf32, #tpu.memory_space<vmem>>, %arg8: memref<512x128xf32, #tpu.memory_space<vmem>>) attributes {dimension_semantics = [#tpu.dimension_semantics<parallel>, #tpu.dimension_semantics<parallel>, #tpu.dimension_semantics<arbitrary>], iteration_bounds = array<i64: 1, 1, 1>, scalar_prefetch = 0 : i64, scratch_operands = 1 : i64, tpu.core_type = #tpu.core_type<tc>, window_params = [{transform_indices = @transform_0, window_bounds = array<i64: 512, 128>}, {transform_indices = @transform_1, window_bounds = array<i64: 128, 128>}, {transform_indices = @transform_2, window_bounds = array<i64: 1, 128>}, {transform_indices = @transform_3, window_bounds = array<i64: 1, 128>}, {transform_indices = @transform_4, window_bounds = array<i64: 512, 128>}]} {
    %c0_i32 = arith.constant 0 : i32
    %0 = arith.cmpi eq, %arg2, %c0_i32 : i32
    %1 = arith.extui %0 : i1 to i32
    %c0_i32_0 = arith.constant 0 : i32
    %2 = arith.cmpi ne, %1, %c0_i32_0 : i32
    scf.if %2 {
      %cst_10 = arith.constant 0.000000e+00 : f32
      %12 = vector.broadcast %cst_10 : f32 to vector<512x128xf32>
      %c0_11 = arith.constant 0 : index
      %c0_12 = arith.constant 0 : index
      %13 = vector.load %arg8[%c0_11, %c0_12] : memref<512x128xf32, #tpu.memory_space<vmem>>, vector<512x128xf32>
      tpu.vector_store %arg8[%c0_11, %c0_12], %12 {strides = array<i32>} : memref<512x128xf32, #tpu.memory_space<vmem>>, vector<512x128xf32>,
    } else {
    }
    %c0 = arith.constant 0 : index
    %c0_1 = arith.constant 0 : index
    %3 = vector.load %arg8[%c0, %c0_1] : memref<512x128xf32, #tpu.memory_space<vmem>>, vector<512x128xf32>
    %c0_2 = arith.constant 0 : index
    %c0_3 = arith.constant 0 : index
    %4 = vector.load %arg3[%c0_2, %c0_3] : memref<512x128xbf16, #tpu.memory_space<vmem>>, vector<512x128xbf16>
    %c0_4 = arith.constant 0 : index
    %c0_5 = arith.constant 0 : index
    %5 = vector.load %arg4[%c0_4, %c0_5] : memref<128x128xbf16, #tpu.memory_space<vmem>>, vector<128x128xbf16>
    %cst = arith.constant dense<0.000000e+00> : vector<512x128xf32>
    %6 = tpu.matmul %4, %5, %cst {dimension_numbers = #tpu.dot_dimension_numbers<[1], [0], [0], [1], [0, 0, 1, 1], [], []>} : vector<512x128xbf16>, vector<128x128xbf16>, vector<512x128xf32> -> vector<512x128xf32>
    %7 = arith.addf %3, %6 : vector<512x128xf32>
    %c0_6 = arith.constant 0 : index
    %c0_7 = arith.constant 0 : index
    %8 = vector.load %arg8[%c0_6, %c0_7] : memref<512x128xf32, #tpu.memory_space<vmem>>, vector<512x128xf32>
    tpu.vector_store %arg8[%c0_6, %c0_7], %7 {strides = array<i32>} : memref<512x128xf32, #tpu.memory_space<vmem>>, vector<512x128xf32>,
    %c0_i32_8 = arith.constant 0 : i32
    %9 = arith.cmpi eq, %arg2, %c0_i32_8 : i32
    %10 = arith.extui %9 : i1 to i32
    %c0_i32_9 = arith.constant 0 : i32
    %11 = arith.cmpi ne, %10, %c0_i32_9 : i32
    scf.if %11 {
      %c0_10 = arith.constant 0 : index
      %c0_11 = arith.constant 0 : index
      %12 = vector.load %arg8[%c0_10, %c0_11] : memref<512x128xf32, #tpu.memory_space<vmem>>, vector<512x128xf32>
      %c0_12 = arith.constant 0 : index
      %c0_13 = arith.constant 0 : index
      %13 = vector.load %arg5[%c0_12, %c0_13] : memref<1x128xf32, #tpu.memory_space<vmem>>, vector<1x128xf32>
      %14 = vector.broadcast %13 : vector<1x128xf32> to vector<512x128xf32>
      %15 = arith.mulf %12, %14 : vector<512x128xf32>
      %c0_14 = arith.constant 0 : index
      %c0_15 = arith.constant 0 : index
      %16 = vector.load %arg6[%c0_14, %c0_15] : memref<1x128xf32, #tpu.memory_space<vmem>>, vector<1x128xf32>
      %17 = vector.broadcast %16 : vector<1x128xf32> to vector<512x128xf32>
      %18 = arith.addf %15, %17 : vector<512x128xf32>
      %c0_16 = arith.constant 0 : index
      %c0_17 = arith.constant 0 : index
      %19 = vector.load %arg7[%c0_16, %c0_17] : memref<512x128xf32, #tpu.memory_space<vmem>>, vector<512x128xf32>
      tpu.vector_store %arg7[%c0_16, %c0_17], %18 {strides = array<i32>} : memref<512x128xf32, #tpu.memory_space<vmem>>, vector<512x128xf32>,
    } else {
    }
    return
  }
  func.func @transform_0(%arg0: i32, %arg1: i32, %arg2: i32) -> (i32, i32) {
    %c0_i32 = arith.constant 0 : i32
    return %arg0, %arg2 : i32, i32
  }
  func.func @transform_1(%arg0: i32, %arg1: i32, %arg2: i32) -> (i32, i32) {
    %c0_i32 = arith.constant 0 : i32
    return %arg2, %arg1 : i32, i32
  }
  func.func @transform_2(%arg0: i32, %arg1: i32, %arg2: i32) -> (i32, i32) {
    %c0_i32 = arith.constant 0 : i32
    %c0_i32_0 = arith.constant 0 : i32
    return %c0_i32, %arg1 : i32, i32
  }
  func.func @transform_3(%arg0: i32, %arg1: i32, %arg2: i32) -> (i32, i32) {
    %c0_i32 = arith.constant 0 : i32
    %c0_i32_0 = arith.constant 0 : i32
    return %c0_i32, %arg1 : i32, i32
  }
  func.func @transform_4(%arg0: i32, %arg1: i32, %arg2: i32) -> (i32, i32) {
    %c0_i32 = arith.constant 0 : i32
    return %arg0, %arg1 : i32, i32
  }
}

</mosaic_0001>

<bundles_post_ra>
// kernel: conv_bn_forward.1
= control target key start
LH: loop header
LB: loop body
LE: loop exit
PB: predicated region body
PF: predicated region fallthrough
CT: control target
= control target key end

     0   :  { %s1857_s1 = inlined_call_operand.vmem [shape: bf16[128,128], index: 1, kind: input, shape index: {}]   ;;  %s1858_s0 = inlined_call_operand.vmem [shape: bf16[512,128], index: 0, kind: input, shape index: {}]   ;;  %s1859_s2 = inlined_call_operand.vmem [shape: f32[1,128], index: 2, kind: input, shape index: {}]   ;;  %s1860_s3 = inlined_call_operand.vmem [shape: f32[1,128], index: 3, kind: input, shape index: {}]   ;;  %s1861_s4 = inlined_call_operand.vmem [shape: f32[512,128], index: 4, kind: output, shape index: {}]  }
   0x1   :  { %v1342_v0 = vld [vmem:[%s1857_s1] sm:$0xff]   ;;  %v1343_v1 = vld [vmem:[%s1857_s1 + $0x8] sm:$0xff]   ;;  %v1344_v2 = vld [vmem:[%s1857_s1 + $0x10] sm:$0xff]  }
   0x2   :  { %1246 = vmatprep.subr.bf16.mxu0 %v1342_v0  ;;  %1326 = vmatprep.subr.bf16.mxu1 %v1342_v0  ;;  %v1345_v3 = vld [vmem:[%s1857_s1 + $0x18] sm:$0xff]   ;;  %v1350_v4 = vld [vmem:[%s1858_s0] sm:$0xff]   ;;  %v1347_v7 = vld [vmem:[%s1857_s1 + $0x28] sm:$0xff]  }
   0x3   :  { %1247 = vmatpush3.bf16.msra.mxu0 %v1342_v0  ;;  %1334 = vmatpush3.bf16.msra.mxu1 %v1342_v0  ;;  %v1351_v5 = vld [vmem:[%s1858_s0 + $0x80] sm:$0xff]   ;;  %v1348_v8 = vld [vmem:[%s1857_s1 + $0x30] sm:$0xff]   ;;  %v1349_v9 = vld [vmem:[%s1857_s1 + $0x38] sm:$0xff]  }
   0x4   :  { %1248 = vmatprep.subr.bf16.mxu0 %v1343_v1  ;;  %1327 = vmatprep.subr.bf16.mxu1 %v1343_v1  ;;  %v1346_v6 = vld [vmem:[%s1857_s1 + $0x20] sm:$0xff]   ;;  %v1352_v10 = vld [vmem:[%s1858_s0 + $0x8] sm:$0xff]   ;;  %v1354_v12 = vld [vmem:[%s1858_s0 + $0x10] sm:$0xff]  }
   0x5   :  { %1262 = vmatprep.mubr.bf16.mxu0 %v1350_v4  ;;  %1294 = vmatprep.mubr.bf16.mxu1 %v1351_v5  ;;  %v1353_v11 = vld [vmem:[%s1858_s0 + $0x88] sm:$0xff]   ;;  %v1355_v13 = vld [vmem:[%s1858_s0 + $0x90] sm:$0xff]   ;;  %v1356_v14 = vld [vmem:[%s1858_s0 + $0x18] sm:$0xff]  }
   0x6   :  { %v1357_v15 = vld [vmem:[%s1858_s0 + $0x98] sm:$0xff]   ;;  %v1358_v16 = vld [vmem:[%s1858_s0 + $0x20] sm:$0xff]   ;;  %v1360_v18 = vld [vmem:[%s1858_s0 + $0x28] sm:$0xff]  }
   0x7   :  { %1249 = vmatpush3.bf16.msra.mxu0 %v1343_v1  ;;  %1335 = vmatpush3.bf16.msra.mxu1 %v1343_v1  ;;  %v1359_v17 = vld [vmem:[%s1858_s0 + $0xa0] sm:$0xff]   ;;  %v1361_v19 = vld [vmem:[%s1858_s0 + $0xa8] sm:$0xff]   ;;  %v1362_v20 = vld [vmem:[%s1858_s0 + $0x30] sm:$0xff]  }
   0x8   :  { %1250 = vmatprep.subr.bf16.mxu0 %v1344_v2  ;;  %1328 = vmatprep.subr.bf16.mxu1 %v1344_v2  ;;  %v1363_v21 = vld [vmem:[%s1858_s0 + $0xb0] sm:$0xff]   ;;  %v1364_v22 = vld [vmem:[%s1858_s0 + $0x38] sm:$0xff]   ;;  %v1366_v24 = vld [vmem:[%s1858_s0 + $0x40] sm:$0xff]  }
   0x9   :  { %v1365_v23 = vld [vmem:[%s1858_s0 + $0xb8] sm:$0xff]   ;;  %v1367_v25 = vld [vmem:[%s1858_s0 + $0xc0] sm:$0xff]   ;;  %v1368_v26 = vld [vmem:[%s1858_s0 + $0x48] sm:$0xff]  }
   0xa   :  { %v1369_v27 = vld [vmem:[%s1858_s0 + $0xc8] sm:$0xff]   ;;  %v1370_v28 = vld [vmem:[%s1858_s0 + $0x50] sm:$0xff]   ;;  %v1372_v30 = vld [vmem:[%s1858_s0 + $0x58] sm:$0xff]  }
   0xb   :  { %1251 = vmatpush3.bf16.msra.mxu0 %v1344_v2  ;;  %1336 = vmatpush3.bf16.msra.mxu1 %v1344_v2  ;;  %v1371_v29 = vld [vmem:[%s1858_s0 + $0xd0] sm:$0xff]   ;;  %v1373_v31 = vld [vmem:[%s1858_s0 + $0xd8] sm:$0xff]   ;;  %v1374_v32 = vld [vmem:[%s1858_s0 + $0x60] sm:$0xff]  }
   0xc   :  { %1252 = vmatprep.subr.bf16.mxu0 %v1345_v3  ;;  %1329 = vmatprep.subr.bf16.mxu1 %v1345_v3  ;;  %v1375_v33 = vld [vmem:[%s1858_s0 + $0xe0] sm:$0xff]   ;;  %v1376_v34 = vld [vmem:[%s1858_s0 + $0x68] sm:$0xff]   ;;  %v1378_v36 = vld [vmem:[%s1858_s0 + $0x70] sm:$0xff]  }
   0xd   :  { %v1377_v35 = vld [vmem:[%s1858_s0 + $0xe8] sm:$0xff]   ;;  %v1379_v37 = vld [vmem:[%s1858_s0 + $0xf0] sm:$0xff]   ;;  %v1380_v38 = vld [vmem:[%s1858_s0 + $0x78] sm:$0xff]  }
   0xe   :  { %v1381_v39 = vld [vmem:[%s1858_s0 + $0xf8] sm:$0xff]   ;;  %v1530_v40 = vld [vmem:[%s1859_s2] ss:$0 sm:$0xff] }
   0xf   :  { %1253 = vmatpush3.bf16.msra.mxu0 %v1345_v3  ;;  %1337 = vmatpush3.bf16.msra.mxu1 %v1345_v3  ;;  %v1535_v42 = vld [vmem:[%s1860_s3] ss:$0 sm:$0xff] }
  0x10   :  { %1254 = vmatprep.subr.bf16.mxu0 %v1346_v6  ;;  %1330 = vmatprep.subr.bf16.mxu1 %v1346_v6 }
  0x13   :  { %1255 = vmatpush3.bf16.msra.mxu0 %v1346_v6  ;;  %1338 = vmatpush3.bf16.msra.mxu1 %v1346_v6 }
  0x14   :  { %1256 = vmatprep.subr.bf16.mxu0 %v1347_v7  ;;  %1331 = vmatprep.subr.bf16.mxu1 %v1347_v7 }
  0x17   :  { %1257 = vmatpush3.bf16.msra.mxu0 %v1347_v7  ;;  %1339 = vmatpush3.bf16.msra.mxu1 %v1347_v7 }
  0x18   :  { %1258 = vmatprep.subr.bf16.mxu0 %v1348_v8  ;;  %1332 = vmatprep.subr.bf16.mxu1 %v1348_v8 }
  0x1b   :  { %1259 = vmatpush3.bf16.msra.mxu0 %v1348_v8  ;;  %1340 = vmatpush3.bf16.msra.mxu1 %v1348_v8 }
  0x1c   :  { %1260 = vmatprep.subr.bf16.mxu0 %v1349_v9  ;;  %1333 = vmatprep.subr.bf16.mxu1 %v1349_v9 }
  0x1f   :  { %1261 = vmatpush3.bf16.msra.mxu0 %v1349_v9  ;;  %1341 = vmatpush3.bf16.msra.mxu1 %v1349_v9 }
  0x22   :  { %1263 = vmatmul.mubr.bf16.vlgmr.msra.gmra.mrb[0].mxu0 %v1352_v10  ;;  %1295 = vmatmul.mubr.bf16.vlgmr.msra.gmra.mrb[0].mxu1 %v1353_v11 }
  0x23   :  { %1266 = vmatprep.mubr.bf16.mxu0 %v1354_v12  ;;  %1298 = vmatprep.mubr.bf16.mxu1 %v1355_v13 }
  0x2a   :  { %1267 = vmatmul.mubr.bf16.gmra.mrb[4].mxu0 %v1356_v14  ;;  %1299 = vmatmul.mubr.bf16.gmra.mrb[4].mxu1 %v1357_v15 }
  0x2b   :  { %1270 = vmatprep.mubr.bf16.mxu0 %v1358_v16  ;;  %1302 = vmatprep.mubr.bf16.mxu1 %v1359_v17 }
  0x32   :  { %1271 = vmatmul.mubr.bf16.gmra.mrb[8].mxu0 %v1360_v18  ;;  %1303 = vmatmul.mubr.bf16.gmra.mrb[8].mxu1 %v1361_v19 }
  0x33   :  { %1274 = vmatprep.mubr.bf16.mxu0 %v1362_v20  ;;  %1306 = vmatprep.mubr.bf16.mxu1 %v1363_v21 }
  0x3a   :  { %1275 = vmatmul.mubr.bf16.gmra.mrb[12].mxu0 %v1364_v22  ;;  %1307 = vmatmul.mubr.bf16.gmra.mrb[12].mxu1 %v1365_v23 }
  0x3b   :  { %1278 = vmatprep.mubr.bf16.mxu0 %v1366_v24  ;;  %1310 = vmatprep.mubr.bf16.mxu1 %v1367_v25 }
  0x42   :  { %1279 = vmatmul.mubr.bf16.gmra.mrb[16].mxu0 %v1368_v26  ;;  %1311 = vmatmul.mubr.bf16.gmra.mrb[16].mxu1 %v1369_v27 }
  0x43   :  { %1282 = vmatprep.mubr.bf16.mxu0 %v1370_v28  ;;  %1314 = vmatprep.mubr.bf16.mxu1 %v1371_v29 }
  0x4a   :  { %1283 = vmatmul.mubr.bf16.gmra.mrb[20].mxu0 %v1372_v30  ;;  %1315 = vmatmul.mubr.bf16.gmra.mrb[20].mxu1 %v1373_v31 }
  0x4b   :  { %1286 = vmatprep.mubr.bf16.mxu0 %v1374_v32  ;;  %1318 = vmatprep.mubr.bf16.mxu1 %v1375_v33 }
  0x52   :  { %1287 = vmatmul.mubr.bf16.gmra.mrb[24].mxu0 %v1376_v34  ;;  %1319 = vmatmul.mubr.bf16.gmra.mrb[24].mxu1 %v1377_v35 }
  0x53   :  { %1290 = vmatprep.mubr.bf16.mxu0 %v1378_v36  ;;  %1322 = vmatprep.mubr.bf16.mxu1 %v1379_v37 }
  0x5a   :  { %1291 = vmatmul.mubr.bf16.gmra.mrb[28].mxu0 %v1380_v38  ;;  %1323 = vmatmul.mubr.bf16.gmra.mrb[28].mxu1 %v1381_v39 }
  0xf5   :  { %v1264_v41 = vpop.f32.mrb[0].mxu0  ;;  %v1296_v43 = vpop.f32.mrb[0].mxu1 }
  0xf6   :  { %v963_v44 = vmul.f32 %v1264_v41, %v1530_v40  ;;  %v995_v45 = vmul.f32 %v1296_v43, %v1530_v40  ;;  %v504_v46 = vpop.f32.mrb[1].mxu0  ;;  %v632_v47 = vpop.f32.mrb[1].mxu1 }
  0xf7   :  { %v961_v48 = vmul.f32 %v1530_v40, %v504_v46  ;;  %v993_v49 = vmul.f32 %v1530_v40, %v632_v47  ;;  %v1265_v50 = vpop.f32.mrb[2].mxu0  ;;  %v1297_v51 = vpop.f32.mrb[2].mxu1 }
  0xf8   :  { %v1034_v52 = vadd.f32 %v1535_v42, %v963_v44  ;;  %v1066_v53 = vadd.f32 %v1535_v42, %v995_v45  ;;  %v964_v54 = vmul.f32 %v1265_v50, %v1530_v40  ;;  %v996_v55 = vmul.f32 %v1297_v51, %v1530_v40  ;;  %v507_v56 = vpop.f32.mrb[3].mxu0  ;;  %v635_v57 = vpop.f32.mrb[3].mxu1 }
  0xf9   :  { %v1032_v58 = vadd.f32 %v1535_v42, %v961_v48  ;;  %v1064_v59 = vadd.f32 %v1535_v42, %v993_v49  ;;  %v962_v60 = vmul.f32 %v1530_v40, %v507_v56  ;;  %v994_v61 = vmul.f32 %v1530_v40, %v635_v57 }
  0xfa   :  { %1098 = vst [vmem:[%s1861_s4 + $0x10] sm:$0xff] %v1034_v52  ;;  %1130 = vst [vmem:[%s1861_s4 + $0x110] sm:$0xff] %v1066_v53  ;;  %v1035_v62 = vadd.f32 %v1535_v42, %v964_v54  ;;  %v1067_v63 = vadd.f32 %v1535_v42, %v996_v55 }
  0xfb   :  { %1096 = vst [vmem:[%s1861_s4] sm:$0xff] %v1032_v58  ;;  %1128 = vst [vmem:[%s1861_s4 + $0x100] sm:$0xff] %v1064_v59  ;;  %v1033_v0 = vadd.f32 %v1535_v42, %v962_v60  ;;  %v1065_v1 = vadd.f32 %v1535_v42, %v994_v61 }
  0xfc   :  { %1099 = vst [vmem:[%s1861_s4 + $0x18] sm:$0xff] %v1035_v62  ;;  %1131 = vst [vmem:[%s1861_s4 + $0x118] sm:$0xff] %v1067_v63 }
  0xfd   :  { %1097 = vst [vmem:[%s1861_s4 + $0x8] sm:$0xff] %v1033_v0  ;;  %1129 = vst [vmem:[%s1861_s4 + $0x108] sm:$0xff] %v1065_v1  ;;  %v1268_v2 = vpop.f32.mrb[4].mxu0  ;;  %v1300_v3 = vpop.f32.mrb[4].mxu1 }
  0xfe   :  { %v967_v4 = vmul.f32 %v1268_v2, %v1530_v40  ;;  %v999_v5 = vmul.f32 %v1300_v3, %v1530_v40  ;;  %v520_v6 = vpop.f32.mrb[5].mxu0  ;;  %v648_v7 = vpop.f32.mrb[5].mxu1 }
  0xff   :  { %v965_v8 = vmul.f32 %v1530_v40, %v520_v6  ;;  %v997_v9 = vmul.f32 %v1530_v40, %v648_v7  ;;  %v1269_v10 = vpop.f32.mrb[6].mxu0  ;;  %v1301_v11 = vpop.f32.mrb[6].mxu1 }
 0x100   :  { %v1038_v12 = vadd.f32 %v1535_v42, %v967_v4  ;;  %v1070_v13 = vadd.f32 %v1535_v42, %v999_v5  ;;  %v968_v14 = vmul.f32 %v1269_v10, %v1530_v40  ;;  %v1000_v15 = vmul.f32 %v1301_v11, %v1530_v40  ;;  %v523_v16 = vpop.f32.mrb[7].mxu0  ;;  %v651_v17 = vpop.f32.mrb[7].mxu1 }
 0x101   :  { %v1036_v18 = vadd.f32 %v1535_v42, %v965_v8  ;;  %v1068_v19 = vadd.f32 %v1535_v42, %v997_v9  ;;  %v966_v20 = vmul.f32 %v1530_v40, %v523_v16  ;;  %v998_v21 = vmul.f32 %v1530_v40, %v651_v17 }
 0x102   :  { %1102 = vst [vmem:[%s1861_s4 + $0x30] sm:$0xff] %v1038_v12  ;;  %1134 = vst [vmem:[%s1861_s4 + $0x130] sm:$0xff] %v1070_v13  ;;  %v1039_v22 = vadd.f32 %v1535_v42, %v968_v14  ;;  %v1071_v23 = vadd.f32 %v1535_v42, %v1000_v15 }
 0x103   :  { %1100 = vst [vmem:[%s1861_s4 + $0x20] sm:$0xff] %v1036_v18  ;;  %1132 = vst [vmem:[%s1861_s4 + $0x120] sm:$0xff] %v1068_v19  ;;  %v1037_v24 = vadd.f32 %v1535_v42, %v966_v20  ;;  %v1069_v25 = vadd.f32 %v1535_v42, %v998_v21 }
 0x104   :  { %1103 = vst [vmem:[%s1861_s4 + $0x38] sm:$0xff] %v1039_v22  ;;  %1135 = vst [vmem:[%s1861_s4 + $0x138] sm:$0xff] %v1071_v23 }
 0x105   :  { %1101 = vst [vmem:[%s1861_s4 + $0x28] sm:$0xff] %v1037_v24  ;;  %1133 = vst [vmem:[%s1861_s4 + $0x128] sm:$0xff] %v1069_v25  ;;  %v1272_v26 = vpop.f32.mrb[8].mxu0  ;;  %v1304_v27 = vpop.f32.mrb[8].mxu1 }
 0x106   :  { %v971_v28 = vmul.f32 %v1272_v26, %v1530_v40  ;;  %v1003_v29 = vmul.f32 %v1304_v27, %v1530_v40  ;;  %v536_v30 = vpop.f32.mrb[9].mxu0  ;;  %v664_v31 = vpop.f32.mrb[9].mxu1 }
 0x107   :  { %v969_v32 = vmul.f32 %v1530_v40, %v536_v30  ;;  %v1001_v33 = vmul.f32 %v1530_v40, %v664_v31  ;;  %v1273_v34 = vpop.f32.mrb[10].mxu0  ;;  %v1305_v35 = vpop.f32.mrb[10].mxu1 }
 0x108   :  { %v1042_v36 = vadd.f32 %v1535_v42, %v971_v28  ;;  %v1074_v37 = vadd.f32 %v1535_v42, %v1003_v29  ;;  %v972_v38 = vmul.f32 %v1273_v34, %v1530_v40  ;;  %v1004_v39 = vmul.f32 %v1305_v35, %v1530_v40  ;;  %v539_v41 = vpop.f32.mrb[11].mxu0  ;;  %v667_v43 = vpop.f32.mrb[11].mxu1 }
 0x109   :  { %v1040_v44 = vadd.f32 %v1535_v42, %v969_v32  ;;  %v1072_v45 = vadd.f32 %v1535_v42, %v1001_v33  ;;  %v970_v46 = vmul.f32 %v1530_v40, %v539_v41  ;;  %v1002_v47 = vmul.f32 %v1530_v40, %v667_v43 }
 0x10a   :  { %1106 = vst [vmem:[%s1861_s4 + $0x50] sm:$0xff] %v1042_v36  ;;  %1138 = vst [vmem:[%s1861_s4 + $0x150] sm:$0xff] %v1074_v37  ;;  %v1043_v48 = vadd.f32 %v1535_v42, %v972_v38  ;;  %v1075_v49 = vadd.f32 %v1535_v42, %v1004_v39 }
 0x10b   :  { %1104 = vst [vmem:[%s1861_s4 + $0x40] sm:$0xff] %v1040_v44  ;;  %1136 = vst [vmem:[%s1861_s4 + $0x140] sm:$0xff] %v1072_v45  ;;  %v1041_v50 = vadd.f32 %v1535_v42, %v970_v46  ;;  %v1073_v51 = vadd.f32 %v1535_v42, %v1002_v47 }
 0x10c   :  { %1107 = vst [vmem:[%s1861_s4 + $0x58] sm:$0xff] %v1043_v48  ;;  %1139 = vst [vmem:[%s1861_s4 + $0x158] sm:$0xff] %v1075_v49 }
 0x10d   :  { %1105 = vst [vmem:[%s1861_s4 + $0x48] sm:$0xff] %v1041_v50  ;;  %1137 = vst [vmem:[%s1861_s4 + $0x148] sm:$0xff] %v1073_v51  ;;  %v1276_v52 = vpop.f32.mrb[12].mxu0  ;;  %v1308_v53 = vpop.f32.mrb[12].mxu1 }
 0x10e   :  { %v975_v54 = vmul.f32 %v1276_v52, %v1530_v40  ;;  %v1007_v55 = vmul.f32 %v1308_v53, %v1530_v40  ;;  %v552_v56 = vpop.f32.mrb[13].mxu0  ;;  %v680_v57 = vpop.f32.mrb[13].mxu1 }
 0x10f   :  { %v973_v58 = vmul.f32 %v1530_v40, %v552_v56  ;;  %v1005_v59 = vmul.f32 %v1530_v40, %v680_v57  ;;  %v1277_v60 = vpop.f32.mrb[14].mxu0  ;;  %v1309_v61 = vpop.f32.mrb[14].mxu1 }
 0x110   :  { %v1046_v62 = vadd.f32 %v1535_v42, %v975_v54  ;;  %v1078_v63 = vadd.f32 %v1535_v42, %v1007_v55  ;;  %v976_v0 = vmul.f32 %v1277_v60, %v1530_v40  ;;  %v1008_v1 = vmul.f32 %v1309_v61, %v1530_v40  ;;  %v555_v2 = vpop.f32.mrb[15].mxu0  ;;  %v683_v3 = vpop.f32.mrb[15].mxu1 }
 0x111   :  { %v1044_v4 = vadd.f32 %v1535_v42, %v973_v58  ;;  %v1076_v5 = vadd.f32 %v1535_v42, %v1005_v59  ;;  %v974_v6 = vmul.f32 %v1530_v40, %v555_v2  ;;  %v1006_v7 = vmul.f32 %v1530_v40, %v683_v3 }
 0x112   :  { %1110 = vst [vmem:[%s1861_s4 + $0x70] sm:$0xff] %v1046_v62  ;;  %1142 = vst [vmem:[%s1861_s4 + $0x170] sm:$0xff] %v1078_v63  ;;  %v1047_v8 = vadd.f32 %v1535_v42, %v976_v0  ;;  %v1079_v9 = vadd.f32 %v1535_v42, %v1008_v1 }
 0x113   :  { %1108 = vst [vmem:[%s1861_s4 + $0x60] sm:$0xff] %v1044_v4  ;;  %1140 = vst [vmem:[%s1861_s4 + $0x160] sm:$0xff] %v1076_v5  ;;  %v1045_v10 = vadd.f32 %v1535_v42, %v974_v6  ;;  %v1077_v11 = vadd.f32 %v1535_v42, %v1006_v7 }
 0x114   :  { %1111 = vst [vmem:[%s1861_s4 + $0x78] sm:$0xff] %v1047_v8  ;;  %1143 = vst [vmem:[%s1861_s4 + $0x178] sm:$0xff] %v1079_v9 }
 0x115   :  { %1109 = vst [vmem:[%s1861_s4 + $0x68] sm:$0xff] %v1045_v10  ;;  %1141 = vst [vmem:[%s1861_s4 + $0x168] sm:$0xff] %v1077_v11  ;;  %v1280_v12 = vpop.f32.mrb[16].mxu0  ;;  %v1312_v13 = vpop.f32.mrb[16].mxu1 }
 0x116   :  { %v979_v14 = vmul.f32 %v1280_v12, %v1530_v40  ;;  %v1011_v15 = vmul.f32 %v1312_v13, %v1530_v40  ;;  %v568_v16 = vpop.f32.mrb[17].mxu0  ;;  %v696_v17 = vpop.f32.mrb[17].mxu1 }
 0x117   :  { %v977_v18 = vmul.f32 %v1530_v40, %v568_v16  ;;  %v1009_v19 = vmul.f32 %v1530_v40, %v696_v17  ;;  %v1281_v20 = vpop.f32.mrb[18].mxu0  ;;  %v1313_v21 = vpop.f32.mrb[18].mxu1 }
 0x118   :  { %v1050_v22 = vadd.f32 %v1535_v42, %v979_v14  ;;  %v1082_v23 = vadd.f32 %v1535_v42, %v1011_v15  ;;  %v980_v24 = vmul.f32 %v1281_v20, %v1530_v40  ;;  %v1012_v25 = vmul.f32 %v1313_v21, %v1530_v40  ;;  %v571_v26 = vpop.f32.mrb[19].mxu0  ;;  %v699_v27 = vpop.f32.mrb[19].mxu1 }
 0x119   :  { %v1048_v28 = vadd.f32 %v1535_v42, %v977_v18  ;;  %v1080_v29 = vadd.f32 %v1535_v42, %v1009_v19  ;;  %v978_v30 = vmul.f32 %v1530_v40, %v571_v26  ;;  %v1010_v31 = vmul.f32 %v1530_v40, %v699_v27 }
 0x11a   :  { %1114 = vst [vmem:[%s1861_s4 + $0x90] sm:$0xff] %v1050_v22  ;;  %1146 = vst [vmem:[%s1861_s4 + $0x190] sm:$0xff] %v1082_v23  ;;  %v1051_v32 = vadd.f32 %v1535_v42, %v980_v24  ;;  %v1083_v33 = vadd.f32 %v1535_v42, %v1012_v25 }
 0x11b   :  { %1112 = vst [vmem:[%s1861_s4 + $0x80] sm:$0xff] %v1048_v28  ;;  %1144 = vst [vmem:[%s1861_s4 + $0x180] sm:$0xff] %v1080_v29  ;;  %v1049_v34 = vadd.f32 %v1535_v42, %v978_v30  ;;  %v1081_v35 = vadd.f32 %v1535_v42, %v1010_v31 }
 0x11c   :  { %1115 = vst [vmem:[%s1861_s4 + $0x98] sm:$0xff] %v1051_v32  ;;  %1147 = vst [vmem:[%s1861_s4 + $0x198] sm:$0xff] %v1083_v33 }
 0x11d   :  { %1113 = vst [vmem:[%s1861_s4 + $0x88] sm:$0xff] %v1049_v34  ;;  %1145 = vst [vmem:[%s1861_s4 + $0x188] sm:$0xff] %v1081_v35  ;;  %v1284_v36 = vpop.f32.mrb[20].mxu0  ;;  %v1316_v37 = vpop.f32.mrb[20].mxu1 }
 0x11e   :  { %v983_v38 = vmul.f32 %v1284_v36, %v1530_v40  ;;  %v1015_v39 = vmul.f32 %v1316_v37, %v1530_v40  ;;  %v584_v41 = vpop.f32.mrb[21].mxu0  ;;  %v712_v43 = vpop.f32.mrb[21].mxu1 }
 0x11f   :  { %v981_v44 = vmul.f32 %v1530_v40, %v584_v41  ;;  %v1013_v45 = vmul.f32 %v1530_v40, %v712_v43  ;;  %v1285_v46 = vpop.f32.mrb[22].mxu0  ;;  %v1317_v47 = vpop.f32.mrb[22].mxu1 }
 0x120   :  { %v1054_v48 = vadd.f32 %v1535_v42, %v983_v38  ;;  %v1086_v49 = vadd.f32 %v1535_v42, %v1015_v39  ;;  %v984_v50 = vmul.f32 %v1285_v46, %v1530_v40  ;;  %v1016_v51 = vmul.f32 %v1317_v47, %v1530_v40  ;;  %v587_v52 = vpop.f32.mrb[23].mxu0  ;;  %v715_v53 = vpop.f32.mrb[23].mxu1 }
 0x121   :  { %v1052_v54 = vadd.f32 %v1535_v42, %v981_v44  ;;  %v1084_v55 = vadd.f32 %v1535_v42, %v1013_v45  ;;  %v982_v56 = vmul.f32 %v1530_v40, %v587_v52  ;;  %v1014_v57 = vmul.f32 %v1530_v40, %v715_v53 }
 0x122   :  { %1118 = vst [vmem:[%s1861_s4 + $0xb0] sm:$0xff] %v1054_v48  ;;  %1150 = vst [vmem:[%s1861_s4 + $0x1b0] sm:$0xff] %v1086_v49  ;;  %v1055_v58 = vadd.f32 %v1535_v42, %v984_v50  ;;  %v1087_v59 = vadd.f32 %v1535_v42, %v1016_v51 }
 0x123   :  { %1116 = vst [vmem:[%s1861_s4 + $0xa0] sm:$0xff] %v1052_v54  ;;  %1148 = vst [vmem:[%s1861_s4 + $0x1a0] sm:$0xff] %v1084_v55  ;;  %v1053_v60 = vadd.f32 %v1535_v42, %v982_v56  ;;  %v1085_v61 = vadd.f32 %v1535_v42, %v1014_v57 }
 0x124   :  { %1119 = vst [vmem:[%s1861_s4 + $0xb8] sm:$0xff] %v1055_v58  ;;  %1151 = vst [vmem:[%s1861_s4 + $0x1b8] sm:$0xff] %v1087_v59 }
 0x125   :  { %1117 = vst [vmem:[%s1861_s4 + $0xa8] sm:$0xff] %v1053_v60  ;;  %1149 = vst [vmem:[%s1861_s4 + $0x1a8] sm:$0xff] %v1085_v61  ;;  %v1288_v62 = vpop.f32.mrb[24].mxu0  ;;  %v1320_v63 = vpop.f32.mrb[24].mxu1 }
 0x126   :  { %v987_v0 = vmul.f32 %v1288_v62, %v1530_v40  ;;  %v1019_v1 = vmul.f32 %v1320_v63, %v1530_v40  ;;  %v600_v2 = vpop.f32.mrb[25].mxu0  ;;  %v728_v3 = vpop.f32.mrb[25].mxu1 }
 0x127   :  { %v985_v4 = vmul.f32 %v1530_v40, %v600_v2  ;;  %v1017_v5 = vmul.f32 %v1530_v40, %v728_v3  ;;  %v1289_v6 = vpop.f32.mrb[26].mxu0  ;;  %v1321_v7 = vpop.f32.mrb[26].mxu1 }
 0x128   :  { %v1058_v8 = vadd.f32 %v1535_v42, %v987_v0  ;;  %v1090_v9 = vadd.f32 %v1535_v42, %v1019_v1  ;;  %v988_v10 = vmul.f32 %v1289_v6, %v1530_v40  ;;  %v1020_v11 = vmul.f32 %v1321_v7, %v1530_v40  ;;  %v603_v12 = vpop.f32.mrb[27].mxu0  ;;  %v731_v13 = vpop.f32.mrb[27].mxu1 }
 0x129   :  { %v1056_v14 = vadd.f32 %v1535_v42, %v985_v4  ;;  %v1088_v15 = vadd.f32 %v1535_v42, %v1017_v5  ;;  %v986_v16 = vmul.f32 %v1530_v40, %v603_v12  ;;  %v1018_v17 = vmul.f32 %v1530_v40, %v731_v13 }
 0x12a   :  { %1122 = vst [vmem:[%s1861_s4 + $0xd0] sm:$0xff] %v1058_v8  ;;  %1154 = vst [vmem:[%s1861_s4 + $0x1d0] sm:$0xff] %v1090_v9  ;;  %v1059_v18 = vadd.f32 %v1535_v42, %v988_v10  ;;  %v1091_v19 = vadd.f32 %v1535_v42, %v1020_v11 }
 0x12b   :  { %1120 = vst [vmem:[%s1861_s4 + $0xc0] sm:$0xff] %v1056_v14  ;;  %1152 = vst [vmem:[%s1861_s4 + $0x1c0] sm:$0xff] %v1088_v15  ;;  %v1057_v20 = vadd.f32 %v1535_v42, %v986_v16  ;;  %v1089_v21 = vadd.f32 %v1535_v42, %v1018_v17 }
 0x12c   :  { %1123 = vst [vmem:[%s1861_s4 + $0xd8] sm:$0xff] %v1059_v18  ;;  %1155 = vst [vmem:[%s1861_s4 + $0x1d8] sm:$0xff] %v1091_v19 }
 0x12d   :  { %1121 = vst [vmem:[%s1861_s4 + $0xc8] sm:$0xff] %v1057_v20  ;;  %1153 = vst [vmem:[%s1861_s4 + $0x1c8] sm:$0xff] %v1089_v21  ;;  %v1292_v22 = vpop.f32.mrb[28].mxu0  ;;  %v1324_v23 = vpop.f32.mrb[28].mxu1 }
 0x12e   :  { %v991_v24 = vmul.f32 %v1292_v22, %v1530_v40  ;;  %v1023_v25 = vmul.f32 %v1324_v23, %v1530_v40  ;;  %v616_v26 = vpop.f32.mrb[29].mxu0  ;;  %v744_v27 = vpop.f32.mrb[29].mxu1 }
 0x12f   :  { %v989_v28 = vmul.f32 %v1530_v40, %v616_v26  ;;  %v1021_v29 = vmul.f32 %v1530_v40, %v744_v27  ;;  %v1293_v30 = vpop.f32.mrb[30].mxu0  ;;  %v1325_v31 = vpop.f32.mrb[30].mxu1 }
 0x130   :  { %v1062_v32 = vadd.f32 %v1535_v42, %v991_v24  ;;  %v1094_v33 = vadd.f32 %v1535_v42, %v1023_v25  ;;  %v992_v34 = vmul.f32 %v1293_v30, %v1530_v40  ;;  %v1024_v35 = vmul.f32 %v1325_v31, %v1530_v40  ;;  %v619_v36 = vpop.f32.mrb[31].mxu0  ;;  %v747_v37 = vpop.f32.mrb[31].mxu1 }
 0x131   :  { %v1060_v38 = vadd.f32 %v1535_v42, %v989_v28  ;;  %v1092_v39 = vadd.f32 %v1535_v42, %v1021_v29  ;;  %v990_v41 = vmul.f32 %v1530_v40, %v619_v36  ;;  %v1022_v43 = vmul.f32 %v1530_v40, %v747_v37 }
 0x132   :  { %1126 = vst [vmem:[%s1861_s4 + $0xf0] sm:$0xff] %v1062_v32  ;;  %1158 = vst [vmem:[%s1861_s4 + $0x1f0] sm:$0xff] %v1094_v33  ;;  %v1063_v44 = vadd.f32 %v1535_v42, %v992_v34  ;;  %v1095_v45 = vadd.f32 %v1535_v42, %v1024_v35 }
 0x133   :  { %1124 = vst [vmem:[%s1861_s4 + $0xe0] sm:$0xff] %v1060_v38  ;;  %1156 = vst [vmem:[%s1861_s4 + $0x1e0] sm:$0xff] %v1092_v39  ;;  %v1061_v40 = vadd.f32 %v1535_v42, %v990_v41  ;;  %v1093_v46 = vadd.f32 %v1535_v42, %v1022_v43 }
 0x134   :  { %1127 = vst [vmem:[%s1861_s4 + $0xf8] sm:$0xff] %v1063_v44  ;;  %1159 = vst [vmem:[%s1861_s4 + $0x1f8] sm:$0xff] %v1095_v45 }
 0x135   :  { %1125 = vst [vmem:[%s1861_s4 + $0xe8] sm:$0xff] %v1061_v40  ;;  %1157 = vst [vmem:[%s1861_s4 + $0x1e8] sm:$0xff] %v1093_v46 }

</bundles_post_ra>
